<compile_context>
chip_gen: v5e
topology: v5e:2x2
jax: 0.10.0
libtpu: 0.0.40
codegen_flags: <defaults>
</compile_context>

<pallas_src>
import functools

import jax
import jax.numpy as jnp
from jax import lax
from jax.experimental import pallas as pl
from jax.experimental.pallas import tpu as pltpu

SIZE = 32        # diora.size
EMB_DIM = 16     # raw embedding dim fed to the projection inside `embed`

_COMPILER_PARAMS = pltpu.CompilerParams(dimension_semantics=("arbitrary",))


# -----------------------------------------------------------------------------
# Fused kernel: embed projection + composition levels + scoring + recon loss
# -----------------------------------------------------------------------------
def _net_fused_kernel(raw_ref, negraw_ref, wproj_ref, wcomp_ref, b_ref,
                      loss_ref, *, B, T):
    S = wproj_ref.shape[1]
    BT = B * T

    # Weights live in vregs for the whole kernel.
    wproj = wproj_ref[...]        # (E, S)   bf16
    wcomp = wcomp_ref[...]        # (2S, S)  bf16  == [W_left; W_right]
    bias = b_ref[...]             # (1, S)   f32

    # --- embed projection: bf16 x bf16 on the MXU, f32 accumulation.
    x = jnp.dot(raw_ref[...], wproj, preferred_element_type=jnp.float32)  # (BT, S)

    # --- reconstruction target (synthetic stand-in): per-sentence mean of x.
    # Vectorized: one cross-sublane reduction instead of B masked row stores.
    pos = jnp.mean(x.reshape(B, T, S), axis=1)                            # (B, S)

    # --- all composition levels fused; chart carried in vregs.
    row_ids = lax.broadcasted_iota(jnp.int32, (BT, S), 0)
    last_row = BT - 1

    def level(_, h):
        # Right child h[i+1] via an XLU sublane rotate (no misaligned slice).
        h_r = pltpu.roll(h, shift=BT - 1, axis=0)                 # h_r[i] = h[i+1]
        pair = jnp.concatenate([h, h_r], axis=-1).astype(jnp.bfloat16)  # (BT, 2S)
        new = jnp.tanh(
            jnp.dot(pair, wcomp, preferred_element_type=jnp.float32) + bias)
        # Row BT-1 wraps to h[0] under the roll; keep its old (level-0) value so
        # the last sentence's (T-2, T-1) pair stays valid at level 1.  Rows past
        # each sentence's shrinking valid length compute garbage that is never
        # read by any valid position (dependency cones stay inside sentences).
        return jnp.where(row_ids < last_row, new, h)

    h = lax.fori_loop(0, T - 1, level, x, unroll=True)

    # root of each sentence = chart row b*T (masked reduce over the T axis).
    h3 = h.reshape(B, T, S)
    t_ids = lax.broadcasted_iota(jnp.int32, (B, T, S), 1)
    root = jnp.sum(jnp.where(t_ids == 0, h3, 0.0), axis=1)                # (B, S)

    # --- negative-sample projection + scoring (transposed contraction).
    neg = jnp.dot(negraw_ref[...], wproj,
                  preferred_element_type=jnp.float32)                     # (N, S)
    pos_s = jnp.sum(root * pos, axis=-1, keepdims=True)                   # (B, 1)
    neg_s = lax.dot_general(root, neg, (((1,), (1,)), ((), ())),
                            preferred_element_type=jnp.float32)           # (B, N)

    # --- stable log_softmax([pos | neg])[:, 0] without materializing the concat.
    m = jnp.maximum(pos_s, jnp.max(neg_s, axis=-1, keepdims=True))
    denom = jnp.exp(pos_s - m) + jnp.sum(jnp.exp(neg_s - m), axis=-1,
                                         keepdims=True)
    logp0 = (pos_s - m) - jnp.log(denom)                                  # (B, 1)

    # TODO(synk): emit the scalar through an SMEM out_spec instead of a padded
    # (1,1) VMEM tile once that path is exercised more broadly; kept VMEM here.
    loss_ref[...] = -jnp.sum(logp0, axis=0, keepdims=True) * (1.0 / B)    # (1, 1)


def pallas_net_fused(raw, neg_raw, w_proj, w_comp, b, B, T):
    BT, E = raw.shape
    N = neg_raw.shape[0]
    S = w_proj.shape[1]
    kernel = functools.partial(_net_fused_kernel, B=B, T=T)
    return pl.pallas_call(
        kernel,
        out_shape=jax.ShapeDtypeStruct((1, 1), jnp.float32),
        grid=(1,),
        in_specs=[pl.BlockSpec((BT, E), lambda i: (0, 0)),
                  pl.BlockSpec((N, E), lambda i: (0, 0)),
                  pl.BlockSpec((E, S), lambda i: (0, 0)),
                  pl.BlockSpec((2 * S, S), lambda i: (0, 0)),
                  pl.BlockSpec((1, S), lambda i: (0, 0))],
        out_specs=pl.BlockSpec((1, 1), lambda i: (0, 0)),
        compiler_params=_COMPILER_PARAMS,
    )(raw, neg_raw, w_proj, w_comp, b)


# -----------------------------------------------------------------------------
# Net (embed -> diora -> loss funcs)
# -----------------------------------------------------------------------------
def init_params(key, vocab):
    # Net.reset_parameters(): every trainable param ~ N(0, 1), deterministic.
    k1, k2, k3, k4 = jax.random.split(key, 4)
    return {
        # bf16 storage for every MXU-facing tensor; accumulation stays f32.
        "table":  jax.random.normal(k1, (vocab, EMB_DIM), jnp.float32).astype(jnp.bfloat16),
        "w_proj": jax.random.normal(k2, (EMB_DIM, SIZE), jnp.float32).astype(jnp.bfloat16),
        "w_comp": jax.random.normal(k3, (2 * SIZE, SIZE), jnp.float32).astype(jnp.bfloat16),
        "b_comp": jax.random.normal(k4, (1, SIZE), jnp.float32),
    }


def net_forward(params, batch_tokens, neg_samples=None, compute_loss=True):
    B, T = batch_tokens.shape

    # --- embed = self.embed(batch): row lookup (XLA gather) feeding the fused
    # kernel's projection.
    # TODO(synk): fuse the gather via scalar-prefetched ids + DMA row gather
    # once vocab / T / Nneg are large enough to matter.
    raw = params["table"][batch_tokens].reshape(B * T, EMB_DIM)           # bf16

    if compute_loss:
        neg_raw = params["table"][neg_samples]                            # (N, E) bf16
    else:
        # diora still runs (as in the PyTorch forward); loss output is discarded.
        neg_raw = jnp.zeros((1, EMB_DIM), jnp.bfloat16)

    loss = pallas_net_fused(raw, neg_raw, params["w_proj"], params["w_comp"],
                            params["b_comp"], B, T)                       # (1, 1)

    if compute_loss:
        # loss = torch.cat([subloss.view(1,1) for ...], 1)  (single loss func)
        ret = {"reconstruct_softmax_loss": loss[0, 0]}
        total = loss
    else:
        ret = {}
        total = jnp.full((1, 1), 1.0, dtype=jnp.float32)

    ret["total_loss"] = total
    return ret


# -----------------------------------------------------------------------------
if __name__ == "__main__":
    key = jax.random.PRNGKey(0)
    k_param, k_tok, k_neg = jax.random.split(key, 3)

    VOCAB, B, T, NNEG = 50, 2, 8, 5
    params = init_params(k_param, VOCAB)
    batch = jax.random.randint(k_tok, (B, T), 0, VOCAB, dtype=jnp.int32)
    neg_samples = jax.random.randint(k_neg, (NNEG,), 0, VOCAB, dtype=jnp.int32)

    out = net_forward(params, batch, neg_samples, compute_loss=True)
    out = jax.tree_util.tree_map(jax.block_until_ready, out)

    # also exercise the compute_loss=False branch
    out_nl = net_forward(params, batch, compute_loss=False)
    out_nl = jax.tree_util.tree_map(jax.block_until_ready, out_nl)

    assert out["total_loss"].shape == (1, 1)
    assert bool(jnp.isfinite(out["total_loss"]).all())
    assert out_nl["total_loss"].shape == (1, 1)
    print("KERNEL_OK")
</pallas_src>

<mosaic_0001>
module attributes {stable_mosaic.version = 11 : i64} {
  func.func @_net_fused_kernel(%arg0: i32, %arg1: memref<16x16xbf16, #tpu.memory_space<vmem>>, %arg2: memref<5x16xbf16, #tpu.memory_space<vmem>>, %arg3: memref<16x32xbf16, #tpu.memory_space<vmem>>, %arg4: memref<64x32xbf16, #tpu.memory_space<vmem>>, %arg5: memref<1x32xf32, #tpu.memory_space<vmem>>, %arg6: memref<1x1xf32, #tpu.memory_space<vmem>>) attributes {dimension_semantics = [#tpu.dimension_semantics<arbitrary>], iteration_bounds = array<i64: 1>, scalar_prefetch = 0 : i64, scratch_operands = 0 : i64, tpu.core_type = #tpu.core_type<tc>, window_params = [{pipeline_mode = #tpu.pipeline_mode<synchronous>, transform_indices = @transform_0, window_bounds = array<i64: 16, 16>}, {pipeline_mode = #tpu.pipeline_mode<synchronous>, transform_indices = @transform_1, window_bounds = array<i64: 5, 16>}, {pipeline_mode = #tpu.pipeline_mode<synchronous>, transform_indices = @transform_2, window_bounds = array<i64: 16, 32>}, {pipeline_mode = #tpu.pipeline_mode<synchronous>, transform_indices = @transform_3, window_bounds = array<i64: 64, 32>}, {pipeline_mode = #tpu.pipeline_mode<synchronous>, transform_indices = @transform_4, window_bounds = array<i64: 1, 32>}, {pipeline_mode = #tpu.pipeline_mode<synchronous>, transform_indices = @transform_5, window_bounds = array<i64: 1, 1>}]} {
    %c0 = arith.constant 0 : index
    %c0_0 = arith.constant 0 : index
    %0 = vector.load %arg3[%c0, %c0_0] : memref<16x32xbf16, #tpu.memory_space<vmem>>, vector<16x32xbf16>
    %c0_1 = arith.constant 0 : index
    %c0_2 = arith.constant 0 : index
    %1 = vector.load %arg4[%c0_1, %c0_2] : memref<64x32xbf16, #tpu.memory_space<vmem>>, vector<64x32xbf16>
    %c0_3 = arith.constant 0 : index
    %c0_4 = arith.constant 0 : index
    %2 = vector.load %arg5[%c0_3, %c0_4] : memref<1x32xf32, #tpu.memory_space<vmem>>, vector<1x32xf32>
    %c0_5 = arith.constant 0 : index
    %c0_6 = arith.constant 0 : index
    %3 = vector.load %arg1[%c0_5, %c0_6] : memref<16x16xbf16, #tpu.memory_space<vmem>>, vector<16x16xbf16>
    %cst = arith.constant dense<0.000000e+00> : vector<16x32xf32>
    %4 = tpu.matmul %3, %0, %cst {dimension_numbers = #tpu.dot_dimension_numbers<[1], [0], [0], [1], [0, 0, 1, 1], [], []>} : vector<16x16xbf16>, vector<16x32xbf16>, vector<16x32xf32> -> vector<16x32xf32>
    %5 = vector.shape_cast %4 : vector<16x32xf32> to vector<2x8x32xf32>
    %cst_7 = arith.constant dense<0.000000e+00> : vector<2x32xf32>
    %6 = vector.multi_reduction <add>, %5, %cst_7 [1] : vector<2x8x32xf32> to vector<2x32xf32>
    %cst_8 = arith.constant 8.000000e+00 : f32
    %7 = vector.broadcast %cst_8 : f32 to vector<2x32xf32>
    %8 = arith.divf %6, %7 : vector<2x32xf32>
    %9 = tpu.iota {dimensions = array<i32: 0>} : vector<16x32xi32>
    %c0_i32 = arith.constant 0 : i32
    %c15_i32 = arith.constant 15 : i32
    %10 = tpu.dynamic_rotate %4 by %c15_i32 dim 0 : vector<16x32xf32>, i32 -> vector<16x32xf32>
    %11 = tpu.concatenate %4, %10 in 1 : vector<16x32xf32>, vector<16x32xf32> -> vector<16x64xf32>
    %12 = arith.truncf %11 : vector<16x64xf32> to vector<16x64xbf16>
    %cst_9 = arith.constant dense<0.000000e+00> : vector<16x32xf32>
    %13 = tpu.matmul %12, %1, %cst_9 {dimension_numbers = #tpu.dot_dimension_numbers<[1], [0], [0], [1], [0, 0, 1, 1], [], []>} : vector<16x64xbf16>, vector<64x32xbf16>, vector<16x32xf32> -> vector<16x32xf32>
    %14 = vector.broadcast %2 : vector<1x32xf32> to vector<16x32xf32>
    %15 = arith.addf %13, %14 : vector<16x32xf32>
    %16 = math.tanh %15 : vector<16x32xf32>
    %c15_i32_10 = arith.constant 15 : i32
    %17 = vector.broadcast %c15_i32_10 : i32 to vector<16x32xi32>
    %18 = arith.cmpi slt, %9, %17 : vector<16x32xi32>
    %19 = arith.select %18, %16, %4 : vector<16x32xi1>, vector<16x32xf32>
    %c1_i32 = arith.constant 1 : i32
    %c15_i32_11 = arith.constant 15 : i32
    %20 = tpu.dynamic_rotate %19 by %c15_i32_11 dim 0 : vector<16x32xf32>, i32 -> vector<16x32xf32>
    %21 = tpu.concatenate %19, %20 in 1 : vector<16x32xf32>, vector<16x32xf32> -> vector<16x64xf32>
    %22 = arith.truncf %21 : vector<16x64xf32> to vector<16x64xbf16>
    %cst_12 = arith.constant dense<0.000000e+00> : vector<16x32xf32>
    %23 = tpu.matmul %22, %1, %cst_12 {dimension_numbers = #tpu.dot_dimension_numbers<[1], [0], [0], [1], [0, 0, 1, 1], [], []>} : vector<16x64xbf16>, vector<64x32xbf16>, vector<16x32xf32> -> vector<16x32xf32>
    %24 = vector.broadcast %2 : vector<1x32xf32> to vector<16x32xf32>
    %25 = arith.addf %23, %24 : vector<16x32xf32>
    %26 = math.tanh %25 : vector<16x32xf32>
    %c15_i32_13 = arith.constant 15 : i32
    %27 = vector.broadcast %c15_i32_13 : i32 to vector<16x32xi32>
    %28 = arith.cmpi slt, %9, %27 : vector<16x32xi32>
    %29 = arith.select %28, %26, %19 : vector<16x32xi1>, vector<16x32xf32>
    %c2_i32 = arith.constant 2 : i32
    %c15_i32_14 = arith.constant 15 : i32
    %30 = tpu.dynamic_rotate %29 by %c15_i32_14 dim 0 : vector<16x32xf32>, i32 -> vector<16x32xf32>
    %31 = tpu.concatenate %29, %30 in 1 : vector<16x32xf32>, vector<16x32xf32> -> vector<16x64xf32>
    %32 = arith.truncf %31 : vector<16x64xf32> to vector<16x64xbf16>
    %cst_15 = arith.constant dense<0.000000e+00> : vector<16x32xf32>
    %33 = tpu.matmul %32, %1, %cst_15 {dimension_numbers = #tpu.dot_dimension_numbers<[1], [0], [0], [1], [0, 0, 1, 1], [], []>} : vector<16x64xbf16>, vector<64x32xbf16>, vector<16x32xf32> -> vector<16x32xf32>
    %34 = vector.broadcast %2 : vector<1x32xf32> to vector<16x32xf32>
    %35 = arith.addf %33, %34 : vector<16x32xf32>
    %36 = math.tanh %35 : vector<16x32xf32>
    %c15_i32_16 = arith.constant 15 : i32
    %37 = vector.broadcast %c15_i32_16 : i32 to vector<16x32xi32>
    %38 = arith.cmpi slt, %9, %37 : vector<16x32xi32>
    %39 = arith.select %38, %36, %29 : vector<16x32xi1>, vector<16x32xf32>
    %c3_i32 = arith.constant 3 : i32
    %c15_i32_17 = arith.constant 15 : i32
    %40 = tpu.dynamic_rotate %39 by %c15_i32_17 dim 0 : vector<16x32xf32>, i32 -> vector<16x32xf32>
    %41 = tpu.concatenate %39, %40 in 1 : vector<16x32xf32>, vector<16x32xf32> -> vector<16x64xf32>
    %42 = arith.truncf %41 : vector<16x64xf32> to vector<16x64xbf16>
    %cst_18 = arith.constant dense<0.000000e+00> : vector<16x32xf32>
    %43 = tpu.matmul %42, %1, %cst_18 {dimension_numbers = #tpu.dot_dimension_numbers<[1], [0], [0], [1], [0, 0, 1, 1], [], []>} : vector<16x64xbf16>, vector<64x32xbf16>, vector<16x32xf32> -> vector<16x32xf32>
    %44 = vector.broadcast %2 : vector<1x32xf32> to vector<16x32xf32>
    %45 = arith.addf %43, %44 : vector<16x32xf32>
    %46 = math.tanh %45 : vector<16x32xf32>
    %c15_i32_19 = arith.constant 15 : i32
    %47 = vector.broadcast %c15_i32_19 : i32 to vector<16x32xi32>
    %48 = arith.cmpi slt, %9, %47 : vector<16x32xi32>
    %49 = arith.select %48, %46, %39 : vector<16x32xi1>, vector<16x32xf32>
    %c4_i32 = arith.constant 4 : i32
    %c15_i32_20 = arith.constant 15 : i32
    %50 = tpu.dynamic_rotate %49 by %c15_i32_20 dim 0 : vector<16x32xf32>, i32 -> vector<16x32xf32>
    %51 = tpu.concatenate %49, %50 in 1 : vector<16x32xf32>, vector<16x32xf32> -> vector<16x64xf32>
    %52 = arith.truncf %51 : vector<16x64xf32> to vector<16x64xbf16>
    %cst_21 = arith.constant dense<0.000000e+00> : vector<16x32xf32>
    %53 = tpu.matmul %52, %1, %cst_21 {dimension_numbers = #tpu.dot_dimension_numbers<[1], [0], [0], [1], [0, 0, 1, 1], [], []>} : vector<16x64xbf16>, vector<64x32xbf16>, vector<16x32xf32> -> vector<16x32xf32>
    %54 = vector.broadcast %2 : vector<1x32xf32> to vector<16x32xf32>
    %55 = arith.addf %53, %54 : vector<16x32xf32>
    %56 = math.tanh %55 : vector<16x32xf32>
    %c15_i32_22 = arith.constant 15 : i32
    %57 = vector.broadcast %c15_i32_22 : i32 to vector<16x32xi32>
    %58 = arith.cmpi slt, %9, %57 : vector<16x32xi32>
    %59 = arith.select %58, %56, %49 : vector<16x32xi1>, vector<16x32xf32>
    %c5_i32 = arith.constant 5 : i32
    %c15_i32_23 = arith.constant 15 : i32
    %60 = tpu.dynamic_rotate %59 by %c15_i32_23 dim 0 : vector<16x32xf32>, i32 -> vector<16x32xf32>
    %61 = tpu.concatenate %59, %60 in 1 : vector<16x32xf32>, vector<16x32xf32> -> vector<16x64xf32>
    %62 = arith.truncf %61 : vector<16x64xf32> to vector<16x64xbf16>
    %cst_24 = arith.constant dense<0.000000e+00> : vector<16x32xf32>
    %63 = tpu.matmul %62, %1, %cst_24 {dimension_numbers = #tpu.dot_dimension_numbers<[1], [0], [0], [1], [0, 0, 1, 1], [], []>} : vector<16x64xbf16>, vector<64x32xbf16>, vector<16x32xf32> -> vector<16x32xf32>
    %64 = vector.broadcast %2 : vector<1x32xf32> to vector<16x32xf32>
    %65 = arith.addf %63, %64 : vector<16x32xf32>
    %66 = math.tanh %65 : vector<16x32xf32>
    %c15_i32_25 = arith.constant 15 : i32
    %67 = vector.broadcast %c15_i32_25 : i32 to vector<16x32xi32>
    %68 = arith.cmpi slt, %9, %67 : vector<16x32xi32>
    %69 = arith.select %68, %66, %59 : vector<16x32xi1>, vector<16x32xf32>
    %c6_i32 = arith.constant 6 : i32
    %c15_i32_26 = arith.constant 15 : i32
    %70 = tpu.dynamic_rotate %69 by %c15_i32_26 dim 0 : vector<16x32xf32>, i32 -> vector<16x32xf32>
    %71 = tpu.concatenate %69, %70 in 1 : vector<16x32xf32>, vector<16x32xf32> -> vector<16x64xf32>
    %72 = arith.truncf %71 : vector<16x64xf32> to vector<16x64xbf16>
    %cst_27 = arith.constant dense<0.000000e+00> : vector<16x32xf32>
    %73 = tpu.matmul %72, %1, %cst_27 {dimension_numbers = #tpu.dot_dimension_numbers<[1], [0], [0], [1], [0, 0, 1, 1], [], []>} : vector<16x64xbf16>, vector<64x32xbf16>, vector<16x32xf32> -> vector<16x32xf32>
    %74 = vector.broadcast %2 : vector<1x32xf32> to vector<16x32xf32>
    %75 = arith.addf %73, %74 : vector<16x32xf32>
    %76 = math.tanh %75 : vector<16x32xf32>
    %c15_i32_28 = arith.constant 15 : i32
    %77 = vector.broadcast %c15_i32_28 : i32 to vector<16x32xi32>
    %78 = arith.cmpi slt, %9, %77 : vector<16x32xi32>
    %79 = arith.select %78, %76, %69 : vector<16x32xi1>, vector<16x32xf32>
    %80 = vector.shape_cast %79 : vector<16x32xf32> to vector<2x8x32xf32>
    %81 = tpu.iota {dimensions = array<i32: 1>} : vector<2x8x32xi32>
    %c0_i32_29 = arith.constant 0 : i32
    %82 = vector.broadcast %c0_i32_29 : i32 to vector<2x8x32xi32>
    %83 = arith.cmpi eq, %81, %82 : vector<2x8x32xi32>
    %cst_30 = arith.constant 0.000000e+00 : f32
    %84 = vector.broadcast %cst_30 : f32 to vector<2x8x32xf32>
    %85 = arith.select %83, %80, %84 : vector<2x8x32xi1>, vector<2x8x32xf32>
    %cst_31 = arith.constant dense<0.000000e+00> : vector<2x32xf32>
    %86 = vector.multi_reduction <add>, %85, %cst_31 [1] : vector<2x8x32xf32> to vector<2x32xf32>
    %c0_32 = arith.constant 0 : index
    %c0_33 = arith.constant 0 : index
    %87 = vector.load %arg2[%c0_32, %c0_33] : memref<5x16xbf16, #tpu.memory_space<vmem>>, vector<5x16xbf16>
    %cst_34 = arith.constant dense<0.000000e+00> : vector<5x32xf32>
    %88 = tpu.matmul %87, %0, %cst_34 {dimension_numbers = #tpu.dot_dimension_numbers<[1], [0], [0], [1], [0, 0, 1, 1], [], []>} : vector<5x16xbf16>, vector<16x32xbf16>, vector<5x32xf32> -> vector<5x32xf32>
    %89 = arith.mulf %86, %8 : vector<2x32xf32>
    %cst_35 = arith.constant dense<0.000000e+00> : vector<2xf32>
    %90 = vector.multi_reduction <add>, %89, %cst_35 [1] : vector<2x32xf32> to vector<2xf32>
    %91 = vector.shape_cast %90 : vector<2xf32> to vector<2x1xf32>
    %cst_36 = arith.constant dense<0.000000e+00> : vector<2x5xf32>
    %92 = tpu.matmul %86, %88, %cst_36 {dimension_numbers = #tpu.dot_dimension_numbers<[1], [1], [0], [0], [0, 0, 1, 0], [], []>} : vector<2x32xf32>, vector<5x32xf32>, vector<2x5xf32> -> vector<2x5xf32>
    %cst_37 = arith.constant dense<0xFF800000> : vector<2xf32>
    %93 = vector.multi_reduction <maximumf>, %92, %cst_37 [1] : vector<2x5xf32> to vector<2xf32>
    %94 = vector.shape_cast %93 : vector<2xf32> to vector<2x1xf32>
    %95 = arith.maximumf %91, %94 : vector<2x1xf32>
    %96 = arith.subf %91, %95 : vector<2x1xf32>
    %97 = math.exp %96 : vector<2x1xf32>
    %98 = vector.broadcast %95 : vector<2x1xf32> to vector<2x5xf32>
    %99 = arith.subf %92, %98 : vector<2x5xf32>
    %100 = math.exp %99 : vector<2x5xf32>
    %cst_38 = arith.constant dense<0.000000e+00> : vector<2xf32>
    %101 = vector.multi_reduction <add>, %100, %cst_38 [1] : vector<2x5xf32> to vector<2xf32>
    %102 = vector.shape_cast %101 : vector<2xf32> to vector<2x1xf32>
    %103 = arith.addf %97, %102 : vector<2x1xf32>
    %104 = arith.subf %91, %95 : vector<2x1xf32>
    %105 = math.log %103 : vector<2x1xf32>
    %106 = arith.subf %104, %105 : vector<2x1xf32>
    %cst_39 = arith.constant dense<0.000000e+00> : vector<1xf32>
    %107 = vector.multi_reduction <add>, %106, %cst_39 [0] : vector<2x1xf32> to vector<1xf32>
    %108 = vector.shape_cast %107 : vector<1xf32> to vector<1x1xf32>
    %cst_40 = arith.constant 0.000000e+00 : f32
    %109 = vector.broadcast %cst_40 : f32 to vector<1x1xf32>
    %110 = arith.subf %109, %108 : vector<1x1xf32>
    %cst_41 = arith.constant 5.000000e-01 : f32
    %111 = vector.broadcast %cst_41 : f32 to vector<1x1xf32>
    %112 = arith.mulf %110, %111 : vector<1x1xf32>
    %c0_42 = arith.constant 0 : index
    %c0_43 = arith.constant 0 : index
    %113 = vector.load %arg6[%c0_42, %c0_43] : memref<1x1xf32, #tpu.memory_space<vmem>>, vector<1x1xf32>
    tpu.vector_store %arg6[%c0_42, %c0_43], %112 {strides = array<i32>} : memref<1x1xf32, #tpu.memory_space<vmem>>, vector<1x1xf32>,
    return
  }
  func.func @transform_0(%arg0: i32) -> (i32, i32) {
    %c0_i32 = arith.constant 0 : i32
    %c0_i32_0 = arith.constant 0 : i32
    %c0_i32_1 = arith.constant 0 : i32
    return %c0_i32, %c0_i32_0 : i32, i32
  }
  func.func @transform_1(%arg0: i32) -> (i32, i32) {
    %c0_i32 = arith.constant 0 : i32
    %c0_i32_0 = arith.constant 0 : i32
    %c0_i32_1 = arith.constant 0 : i32
    return %c0_i32, %c0_i32_0 : i32, i32
  }
  func.func @transform_2(%arg0: i32) -> (i32, i32) {
    %c0_i32 = arith.constant 0 : i32
    %c0_i32_0 = arith.constant 0 : i32
    %c0_i32_1 = arith.constant 0 : i32
    return %c0_i32, %c0_i32_0 : i32, i32
  }
  func.func @transform_3(%arg0: i32) -> (i32, i32) {
    %c0_i32 = arith.constant 0 : i32
    %c0_i32_0 = arith.constant 0 : i32
    %c0_i32_1 = arith.constant 0 : i32
    return %c0_i32, %c0_i32_0 : i32, i32
  }
  func.func @transform_4(%arg0: i32) -> (i32, i32) {
    %c0_i32 = arith.constant 0 : i32
    %c0_i32_0 = arith.constant 0 : i32
    %c0_i32_1 = arith.constant 0 : i32
    return %c0_i32, %c0_i32_0 : i32, i32
  }
  func.func @transform_5(%arg0: i32) -> (i32, i32) {
    %c0_i32 = arith.constant 0 : i32
    %c0_i32_0 = arith.constant 0 : i32
    %c0_i32_1 = arith.constant 0 : i32
    return %c0_i32, %c0_i32_0 : i32, i32
  }
}

</mosaic_0001>

<bundles_post_ra>
// kernel: tpu_custom_call.1
= control target key start
LH: loop header
LB: loop body
LE: loop exit
PB: predicated region body
PF: predicated region fallthrough
CT: control target
= control target key end

     0   :  { %s818_s0 = inlined_call_operand.vmem [shape: bf16[16,16], index: 0, kind: input, shape index: {}]   ;;  %s819_s1 = inlined_call_operand.vmem [shape: bf16[5,16], index: 1, kind: input, shape index: {}]   ;;  %s820_s2 = inlined_call_operand.vmem [shape: bf16[16,32], index: 2, kind: input, shape index: {}]   ;;  %s821_s3 = inlined_call_operand.vmem [shape: bf16[64,32], index: 3, kind: input, shape index: {}]   ;;  %s822_s4 = inlined_call_operand.vmem [shape: f32[1,32], index: 4, kind: input, shape index: {}]   ;;  %s823_s5 = inlined_call_operand.hbm [shape: f32[1,1], index: 5, kind: output, shape index: {}]  }
   0x1   :  { %v528_v0 = vld [vmem:[%s820_s2] sm:$0xff] }
   0x2   :  { %v533_v1 = vld [vmem:[%s818_s0] sm:$0xff] }
   0x3   :  { %10 = vsyncpa [#allocation3], 0  ;;  %57 = vmatpush.bf16.msra.mxu0 %v528_v0  ;;  %vm46_vm0 = vcmask 130048   ;;  %v532_v2 = vld [vmem:[%s821_s3 + $0x18] sm:$0xff]  ;;  %v531_v3 = vld [vmem:[%s821_s3 + $0x10] sm:$0xff]  ;;  %v88_v6 = vlaneseq  ;;  %s635_s26 = smov 32  }
   0x4   :  { %142 = vmatpush.bf16.msra.mxu1 %v532_v2  ;;  %180 = vmatpush.bf16.msra.mxu2 %v532_v2  ;;  %v530_v4 = vld [vmem:[%s821_s3 + $0x8] sm:$0xff]  ;;  %v529_v14 = vld [vmem:[%s821_s3] sm:$0xff]  ;;  %vm64_vm2 = vcmask 261120   ;;  %vm134_vm3 = vcmask 523264   ;;  %vm412_vm7 = vcmask 1041409   ;;  %vm415_vm8 = vcmask 254976  }
   0x5   :  { %216 = vmatpush.bf16.msra.mxu3 %v532_v2  ;;  %v686_v7 = vshrl.u32 %v88_v6, 7  ;;  %v709_v22 = vld [vmem:[%s822_s4] ss:$0 sm:$0xff]  ;;  %vm447_vm9 = vcmask 33792   ;;  %vm465_vm10 = vcmask 1041408   ;;  %s484_s9 = sshll.u32 %s823_s5, 4  ;;  %s485_s9 = int_to_ptr.hbm [resolvable:$true] %s484_s9 }
   0x6   :  { %501 = vmatmul.msk.bf16.vlgmr.msra.gmra.mxu0 %vm46_vm0, %v533_v1  ;;  %vm475_vm11 = vcmask 0  }
   0x7   :  { %252 = vmatpush.bf16.msrb.mxu0 %v532_v2  ;;  %vm93_vm1 = vcmp.lt.s32.totalorder %v686_v7, 7  ;;  %v714_v26 = vadd.s32 8, %v686_v7  ;;  %vm374_vm5 = vcmp.eq.s32.totalorder %v686_v7, 0 }
   0x8   :  { %143 = vmatpush.bf16.msra.mxu1 %v531_v3  ;;  %181 = vmatpush.bf16.msra.mxu2 %v531_v3 }
   0x9   :  { %217 = vmatpush.bf16.msra.mxu3 %v531_v3  ;;  %vm155_vm4 = vcmp.lt.s32.totalorder %v714_v26, 15 }
   0xb   :  { %253 = vmatpush.bf16.msrb.mxu0 %v531_v3 }
   0xc   :  { %144 = vmatpush.bf16.msra.mxu1 %v530_v4  ;;  %182 = vmatpush.bf16.msra.mxu2 %v530_v4 }
   0xd   :  { %218 = vmatpush.bf16.msra.mxu3 %v530_v4 }
   0xf   :  { %254 = vmatpush.bf16.msrb.mxu0 %v530_v4 }
  0x10   :  { %145 = vmatpush.bf16.msra.mxu1 %v529_v14  ;;  %183 = vmatpush.bf16.msra.mxu2 %v529_v14 }
  0x11   :  { %219 = vmatpush.bf16.msra.mxu3 %v529_v14 }
  0x13   :  { %255 = vmatpush.bf16.msrb.mxu0 %v529_v14 }
  0x14   :  { %288 = vmatpush.bf16.msrb.mxu1 %v532_v2  ;;  %324 = vmatpush.bf16.msrb.mxu2 %v532_v2 }
  0x15   :  { %360 = vmatpush.bf16.msrb.mxu3 %v532_v2 }
  0x17   :  { %402 = vmatpush.bf16.msra.mxu0 %v528_v0 }
  0x18   :  { %289 = vmatpush.bf16.msrb.mxu1 %v531_v3  ;;  %325 = vmatpush.bf16.msrb.mxu2 %v531_v3 }
  0x19   :  { %361 = vmatpush.bf16.msrb.mxu3 %v531_v3 }
  0x1c   :  { %290 = vmatpush.bf16.msrb.mxu1 %v530_v4  ;;  %326 = vmatpush.bf16.msrb.mxu2 %v530_v4 }
  0x1d   :  { %362 = vmatpush.bf16.msrb.mxu3 %v530_v4 }
  0x20   :  { %291 = vmatpush.bf16.msrb.mxu1 %v529_v14  ;;  %327 = vmatpush.bf16.msrb.mxu2 %v529_v14 }
  0x21   :  { %363 = vmatpush.bf16.msrb.mxu3 %v529_v14 }
  0x83   :  { %v684_v5 = vpop.f32.mrf.mxu0 }
  0x84   :  { %v91_v9 = vrot.slane %v684_v5, 1 }
  0x8b   :  { %v688_v8 = vpop.f32.mrf.mxu0 }
  0x8c   :  { %v92_v10 = vrot.slane %v688_v8, 1 }
  0x8e   :  { %v94_v11 = vsel %vm93_vm1, %v91_v9, %v92_v10  ;;  %v95_v12 = vsel %vm93_vm1, %v92_v10, %v91_v9 }
  0x8f   :  { %v537_v13 = vpack.i.bf16 %v95_v12, %v94_v11 }
  0x91   :  { %538 = vrot.lane.b32.xlu0 %v537_v13, %s635_s26 }
 0x103   :  { %v539_v15 = vpop.permute.xlu0 %538 }
 0x104   :  { %v541_v16 = vunpack.i.h.bf16 %v539_v15  ;;  %v540_v17 = vunpack.i.l.bf16 %v539_v15 }
 0x106   :  { %v104_v18 = vsel %vm64_vm2, %v684_v5, %v540_v17  ;;  %v105_v19 = vsel %vm64_vm2, %v688_v8, %v541_v16 }
 0x107   :  { %v106_v20 = vpack.c.bf16 %v105_v19, %v104_v18 }
 0x109   :  { %518 = vmatmul.msk.bf16.vlgmr.msra.gmra.mxu1 %vm134_vm3, %v106_v20 }
 0x186   :  { %v147_v21 = vpop.f32.mrf.mxu1 }
 0x187   :  { %v148_v23 = vadd.f32 %v709_v22, %v147_v21 }
 0x189   :  { %573 = vtanh.f32 %v148_v23 }
 0x18e   :  { %v149_v24 = vpop.f32.mrf.mxu1 }
 0x18f   :  { %v150_v25 = vadd.f32 %v709_v22, %v149_v24  ;;  %v574_v27 = vpop.eup %573 }
 0x190   :  { %v158_v30 = vrot.slane %v574_v27, 1 }
 0x191   :  { %575 = vtanh.f32 %v150_v25 }
 0x197   :  { %v576_v28 = vpop.eup %575 }
 0x198   :  { %v157_v29 = vsel %vm155_vm4, %v576_v28, %v688_v8 }
 0x199   :  { %v159_v31 = vrot.slane %v157_v29, 1 }
 0x19b   :  { %v160_v32 = vsel %vm93_vm1, %v158_v30, %v159_v31  ;;  %v161_v33 = vsel %vm93_vm1, %v159_v31, %v158_v30 }
 0x19c   :  { %v542_v34 = vpack.i.bf16 %v161_v33, %v160_v32 }
 0x19e   :  { %543 = vrot.lane.b32.xlu0 %v542_v34, %s635_s26 }
 0x210   :  { %v544_v35 = vpop.permute.xlu0 %543 }
 0x211   :  { %v546_v36 = vunpack.i.h.bf16 %v544_v35  ;;  %v545_v37 = vunpack.i.l.bf16 %v544_v35 }
 0x213   :  { %v170_v38 = vsel %vm64_vm2, %v574_v27, %v545_v37  ;;  %v171_v39 = vsel %vm64_vm2, %v157_v29, %v546_v36 }
 0x214   :  { %v172_v40 = vpack.c.bf16 %v171_v39, %v170_v38 }
 0x216   :  { %519 = vmatmul.msk.bf16.vlgmr.msra.gmra.mxu2 %vm134_vm3, %v172_v40 }
 0x299   :  { %v185_v41 = vpop.f32.mrf.mxu2 }
 0x29a   :  { %v186_v42 = vadd.f32 %v709_v22, %v185_v41 }
 0x29c   :  { %577 = vtanh.f32 %v186_v42 }
 0x2a1   :  { %v187_v43 = vpop.f32.mrf.mxu2 }
 0x2a2   :  { %v188_v44 = vadd.f32 %v709_v22, %v187_v43  ;;  %v578_v45 = vpop.eup %577 }
 0x2a3   :  { %v194_v48 = vrot.slane %v578_v45, 1 }
 0x2a4   :  { %579 = vtanh.f32 %v188_v44 }
 0x2aa   :  { %v580_v46 = vpop.eup %579 }
 0x2ab   :  { %v193_v47 = vsel %vm155_vm4, %v580_v46, %v688_v8 }
 0x2ac   :  { %v195_v49 = vrot.slane %v193_v47, 1 }
 0x2ae   :  { %v196_v50 = vsel %vm93_vm1, %v194_v48, %v195_v49  ;;  %v197_v51 = vsel %vm93_vm1, %v195_v49, %v194_v48 }
 0x2af   :  { %v547_v52 = vpack.i.bf16 %v197_v51, %v196_v50 }
 0x2b1   :  { %548 = vrot.lane.b32.xlu1 %v547_v52, %s635_s26 }
 0x323   :  { %v549_v53 = vpop.permute.xlu1 %548 }
 0x324   :  { %v551_v54 = vunpack.i.h.bf16 %v549_v53  ;;  %v550_v55 = vunpack.i.l.bf16 %v549_v53 }
 0x326   :  { %v206_v56 = vsel %vm64_vm2, %v578_v45, %v550_v55  ;;  %v207_v57 = vsel %vm64_vm2, %v193_v47, %v551_v54 }
 0x327   :  { %v208_v58 = vpack.c.bf16 %v207_v57, %v206_v56 }
 0x329   :  { %520 = vmatmul.msk.bf16.vlgmr.msra.gmra.mxu3 %vm134_vm3, %v208_v58 }
 0x3ac   :  { %v221_v59 = vpop.f32.mrf.mxu3 }
 0x3ad   :  { %v222_v60 = vadd.f32 %v709_v22, %v221_v59 }
 0x3af   :  { %581 = vtanh.f32 %v222_v60 }
 0x3b4   :  { %v223_v61 = vpop.f32.mrf.mxu3 }
 0x3b5   :  { %v224_v62 = vadd.f32 %v709_v22, %v223_v61  ;;  %v582_v63 = vpop.eup %581 }
 0x3b6   :  { %v230_v2 = vrot.slane %v582_v63, 1 }
 0x3b7   :  { %583 = vtanh.f32 %v224_v62 }
 0x3bd   :  { %v584_v0 = vpop.eup %583 }
 0x3be   :  { %v229_v1 = vsel %vm155_vm4, %v584_v0, %v688_v8 }
 0x3bf   :  { %v231_v3 = vrot.slane %v229_v1, 1 }
 0x3c1   :  { %v232_v4 = vsel %vm93_vm1, %v230_v2, %v231_v3  ;;  %v233_v6 = vsel %vm93_vm1, %v231_v3, %v230_v2  ;;  %v391_v2 = vld [vmem:[%s819_s1] sm:$0x7]  ;;  %s637_s1 = smov [#allocation2]  }
 0x3c2   :  { %v552_v9 = vpack.i.bf16 %v233_v6, %v232_v4  ;;  %s482_s6 = sshll.u32 %s637_s1, 4  ;;  %s483_s6 = int_to_ptr.vmem [resolvable:$true] %s482_s6 }
 0x3c4   :  { %553 = vrot.lane.b32.xlu1 %v552_v9, %s635_s26 }
 0x436   :  { %v554_v10 = vpop.permute.xlu1 %553 }
 0x437   :  { %v556_v11 = vunpack.i.h.bf16 %v554_v10  ;;  %v555_v12 = vunpack.i.l.bf16 %v554_v10 }
 0x439   :  { %v243_v13 = vsel %vm64_vm2, %v229_v1, %v556_v11  ;;  %v242_v14 = vsel %vm64_vm2, %v582_v63, %v555_v12 }
 0x43a   :  { %v244_v15 = vpack.c.bf16 %v243_v13, %v242_v14 }
 0x43c   :  { %521 = vmatmul.msk.bf16.vlgmr.msrb.gmra.mxu0 %vm134_vm3, %v244_v15 }
 0x44c   :  { %525 = vmatmul.msk.bf16.vlgmr.msra.gmra.mxu0 %vm46_vm0, %v391_v2 }
 0x4b9   :  { %v257_v16 = vpop.f32.mrf.mxu0 }
 0x4ba   :  { %v258_v17 = vadd.f32 %v709_v22, %v257_v16  ;;  %v636_v16 = vmov 8.0  }
 0x4bc   :  { %585 = vtanh.f32 %v258_v17  ;;  %v65_v17 = vsel %vm64_vm2, %v684_v5, 0.0 }
 0x4c1   :  { %v259_v18 = vpop.f32.mrf.mxu0 }
 0x4c2   :  { %v260_v19 = vadd.f32 %v709_v22, %v259_v18  ;;  %v586_v20 = vpop.eup %585  ;;  %v72_v18 = vsel %vm64_vm2, %v688_v8, 0.0 }
 0x4c3   :  { %v266_v24 = vrot.slane %v586_v20, 1 }
 0x4c4   :  { %587 = vtanh.f32 %v260_v19  ;;  %v66_v19 = vrot.slane %v65_v17, 4 }
 0x4c9   :  { %v404_v12 = vpop.f32.mrf.mxu0 }
 0x4ca   :  { %v588_v21 = vpop.eup %587  ;;  %526 = vmatpush.xpose.msk.msra.mxu1 %vm64_vm2, %v404_v12 }
 0x4cb   :  { %v265_v23 = vsel %vm155_vm4, %v588_v21, %v688_v8 }
 0x4cc   :  { %v267_v25 = vrot.slane %v265_v23, 1 }
 0x4ce   :  { %v268_v27 = vsel %vm93_vm1, %v266_v24, %v267_v25  ;;  %v269_v28 = vsel %vm93_vm1, %v267_v25, %v266_v24 }
 0x4cf   :  { %v557_v29 = vpack.i.bf16 %v269_v28, %v268_v27  ;;  %v67_v28 = vadd.f32 %v66_v19, %v65_v17 }
 0x4d1   :  { %558 = vrot.lane.b32.xlu2 %v557_v29, %s635_s26  ;;  %v406_v13 = vpop.f32.mrf.mxu0 }
 0x52b   :  { %v559_v30 = vpop.permute.xlu2 %558 }
 0x52c   :  { %v561_v31 = vunpack.i.h.bf16 %v559_v30  ;;  %v560_v32 = vunpack.i.l.bf16 %v559_v30 }
 0x52e   :  { %v279_v33 = vsel %vm64_vm2, %v265_v23, %v561_v31  ;;  %v278_v34 = vsel %vm64_vm2, %v586_v20, %v560_v32  ;;  %v73_v20 = vrot.slane %v72_v18, 4 }
 0x52f   :  { %v280_v35 = vpack.c.bf16 %v279_v33, %v278_v34  ;;  %v68_v33 = vrot.slane %v67_v28, 2 }
 0x530   :  { %v74_v5 = vadd.f32 %v73_v20, %v72_v18 }
 0x531   :  { %522 = vmatmul.msk.bf16.vlgmr.msrb.gmra.mxu1 %vm134_vm3, %v280_v35 }
 0x532   :  { %v75_v34 = vrot.slane %v74_v5, 2 }
 0x5ae   :  { %v293_v36 = vpop.f32.mrf.mxu1 }
 0x5af   :  { %v294_v37 = vadd.f32 %v709_v22, %v293_v36 }
 0x5b1   :  { %589 = vtanh.f32 %v294_v37 }
 0x5b6   :  { %v295_v38 = vpop.f32.mrf.mxu1 }
 0x5b7   :  { %v296_v39 = vadd.f32 %v709_v22, %v295_v38  ;;  %v590_v40 = vpop.eup %589  ;;  %v69_v38 = vadd.f32 %v68_v33, %v67_v28 }
 0x5b8   :  { %v302_v43 = vrot.slane %v590_v40, 1 }
 0x5b9   :  { %591 = vtanh.f32 %v296_v39 }
 0x5bf   :  { %v592_v41 = vpop.eup %591 }
 0x5c0   :  { %v301_v42 = vsel %vm155_vm4, %v592_v41, %v688_v8 }
 0x5c1   :  { %v303_v44 = vrot.slane %v301_v42, 1 }
 0x5c3   :  { %v304_v45 = vsel %vm93_vm1, %v302_v43, %v303_v44  ;;  %v305_v46 = vsel %vm93_vm1, %v303_v44, %v302_v43 }
 0x5c4   :  { %v562_v47 = vpack.i.bf16 %v305_v46, %v304_v45  ;;  %v70_v45 = vrot.slane %v69_v38, 1 }
 0x5c6   :  { %563 = vrot.lane.b32.xlu2 %v562_v47, %s635_s26 }
 0x620   :  { %v564_v48 = vpop.permute.xlu2 %563 }
 0x621   :  { %v566_v49 = vunpack.i.h.bf16 %v564_v48  ;;  %v565_v50 = vunpack.i.l.bf16 %v564_v48 }
 0x623   :  { %v315_v51 = vsel %vm64_vm2, %v301_v42, %v566_v49  ;;  %v314_v52 = vsel %vm64_vm2, %v590_v40, %v565_v50  ;;  %v76_v40 = vadd.f32 %v75_v34, %v74_v5 }
 0x624   :  { %v316_v53 = vpack.c.bf16 %v315_v51, %v314_v52  ;;  %v71_v51 = vadd.f32 %v70_v45, %v69_v38 }
 0x625   :  { %v77_v47 = vrot.slane %v76_v40, 1 }
 0x626   :  { %523 = vmatmul.msk.bf16.vlgmr.msrb.gmra.mxu2 %vm134_vm3, %v316_v53 }
 0x6a9   :  { %v329_v54 = vpop.f32.mrf.mxu2 }
 0x6aa   :  { %v330_v55 = vadd.f32 %v709_v22, %v329_v54 }
 0x6ac   :  { %593 = vtanh.f32 %v330_v55 }
 0x6b1   :  { %v331_v56 = vpop.f32.mrf.mxu2 }
 0x6b2   :  { %v332_v57 = vadd.f32 %v709_v22, %v331_v56  ;;  %v594_v58 = vpop.eup %593 }
 0x6b3   :  { %v338_v61 = vrot.slane %v594_v58, 1 }
 0x6b4   :  { %595 = vtanh.f32 %v332_v57 }
 0x6b5   :  { %597 = vrcp.f32 %v636_v16 }
 0x6ba   :  { %v596_v59 = vpop.eup %595 }
 0x6bb   :  { %v337_v60 = vsel %vm155_vm4, %v596_v59, %v688_v8  ;;  %v598_v21 = vpop.eup %597 }
 0x6bc   :  { %v339_v62 = vrot.slane %v337_v60, 1  ;;  %v80_v31 = vmul.f32 8.0, %v598_v21  ;;  %vm84_vm6 = vweird.f32 %v598_v21 }
 0x6be   :  { %v340_v63 = vsel %vm93_vm1, %v338_v61, %v339_v62  ;;  %v341_v0 = vsel %vm93_vm1, %v339_v62, %v338_v61  ;;  %v81_v35 = vsub.f32 1.0, %v80_v31 }
 0x6bf   :  { %v567_v1 = vpack.i.bf16 %v341_v0, %v340_v63 }
 0x6c0   :  { %v82_v42 = vmul.f32 %v598_v21, %v81_v35 }
 0x6c1   :  { %568 = vrot.lane.b32.xlu0 %v567_v1, %s635_s26 }
 0x6c2   :  { %v83_v48 = vadd.f32 %v598_v21, %v82_v42 }
 0x6c4   :  { %v85_v52 = vsel %vm84_vm6, %v598_v21, %v83_v48 }
 0x6c5   :  { %v86_v55 = vmul.f32 %v85_v52, %v71_v51 }
 0x733   :  { %v569_v3 = vpop.permute.xlu0 %568 }
 0x734   :  { %v571_v4 = vunpack.i.h.bf16 %v569_v3  ;;  %v570_v6 = vunpack.i.l.bf16 %v569_v3 }
 0x736   :  { %v351_v9 = vsel %vm64_vm2, %v337_v60, %v571_v4  ;;  %v350_v10 = vsel %vm64_vm2, %v594_v58, %v570_v6 }
 0x737   :  { %v352_v11 = vpack.c.bf16 %v351_v9, %v350_v10 }
 0x739   :  { %524 = vmatmul.msk.bf16.vlgmr.msrb.gmra.mxu3 %vm134_vm3, %v352_v11 }
 0x7bc   :  { %v365_v14 = vpop.f32.mrf.mxu3 }
 0x7bd   :  { %v366_v15 = vadd.f32 %v709_v22, %v365_v14 }
 0x7bf   :  { %599 = vtanh.f32 %v366_v15 }
 0x7c4   :  { %v367_v23 = vpop.f32.mrf.mxu3 }
 0x7c5   :  { %v600_v24 = vpop.eup %599  ;;  %v368_v25 = vadd.f32 %v709_v22, %v367_v23 }
 0x7c6   :  { %v375_v27 = vsel %vm374_vm5, %v600_v24, 0.0 }
 0x7c7   :  { %v377_v29 = vsel %vm64_vm2, %v375_v27, 0.0  ;;  %601 = vtanh.f32 %v368_v25 }
 0x7c8   :  { %v378_v30 = vrot.slane %v377_v29, 4 }
 0x7ca   :  { %v379_v32 = vadd.f32 %v378_v30, %v377_v29 }
 0x7cc   :  { %v380_v37 = vrot.slane %v379_v32, 2 }
 0x7cd   :  { %v602_v36 = vpop.eup %601 }
 0x7ce   :  { %v373_v22 = vsel %vm155_vm4, %v602_v36, %v688_v8  ;;  %v381_v43 = vadd.f32 %v380_v37, %v379_v32  ;;  %v78_v8 = vadd.f32 %v77_v47, %v76_v40 }
 0x7cf   :  { %v376_v39 = vsel %vm374_vm5, %v373_v22, 0.0 }
 0x7d0   :  { %v384_v41 = vsel %vm64_vm2, %v376_v39, 0.0  ;;  %v382_v49 = vrot.slane %v381_v43, 1  ;;  %v87_v56 = vmul.f32 %v85_v52, %v78_v8 }
 0x7d1   :  { %v385_v44 = vrot.slane %v384_v41, 4 }
 0x7d2   :  { %v383_v53 = vadd.f32 %v382_v49, %v381_v43 }
 0x7d3   :  { %v386_v46 = vadd.f32 %v385_v44, %v384_v41 }
 0x7d4   :  { %v408_v58 = vmul.f32 %v383_v53, %v86_v55 }
 0x7d5   :  { %v387_v50 = vrot.slane %v386_v46, 2 }
 0x7d7   :  { %v388_v26 = vadd.f32 %v387_v50, %v386_v46 }
 0x7d9   :  { %v389_v7 = vrot.slane %v388_v26, 1 }
 0x7db   :  { %v390_v54 = vadd.f32 %v389_v7, %v388_v26 }
 0x7dd   :  { %v421_v57 = vsel %vm412_vm7, %v390_v54, %v383_v53  ;;  %v409_v59 = vmul.f32 %v390_v54, %v87_v56 }
 0x7de   :  { %527 = vmatmul.msk.f32.vlgmr.msra.gmra.mxu1 %vm64_vm2, %v421_v57 }
 0x7df   :  { %v413_v60 = vsel %vm412_vm7, %v409_v59, %v408_v58 }
 0x7e0   :  { %v416_v61 = vsel %vm415_vm8, %v413_v60, 0.0 }
 0x7e1   :  { %417 = vadd.xlane.f32.xlu1 %v416_v61 }
 0x854   :  { %v418_v0 = vpop.xlane.xlu1 %417 }
 0x85b   :  { %v444_v62 = vpop.f32.mrf.mxu1 }
 0x85c   :  { %v448_v63 = vsel %vm447_vm9, %v444_v62, -inf }
 0x85d   :  { %449 = vmax.xlane.f32.xlu2 %v448_v63 }
 0x8d0   :  { %v450_v1 = vpop.xlane.xlu2 %449 }
 0x8d1   :  { %v451_v2 = vmax.f32 %v418_v0, %v450_v1 }
 0x8d3   :  { %v452_v3 = vsub.f32 %v418_v0, %v451_v2  ;;  %v455_v4 = vsub.f32 %v444_v62, %v451_v2 }
 0x8d5   :  { %v456_v6 = vmul.f32 1.442695, %v455_v4  ;;  %v453_v11 = vmul.f32 1.442695, %v452_v3 }
 0x8d7   :  { %603 = vpow2.f32 %v456_v6 }
 0x8d8   :  { %605 = vpow2.f32 %v453_v11 }
 0x8dd   :  { %v604_v9 = vpop.eup %603 }
 0x8de   :  { %v458_v10 = vsel %vm447_vm9, %v604_v9, 0.0  ;;  %v606_v12 = vpop.eup %605 }
 0x8df   :  { %459 = vadd.xlane.f32.xlu0 %v458_v10 }
 0x952   :  { %v460_v13 = vpop.xlane.xlu0 %459 }
 0x953   :  { %v461_v14 = vadd.f32 %v606_v12, %v460_v13 }
 0x955   :  { %607 = vlog2.f32 %v461_v14 }
 0x95b   :  { %v608_v15 = vpop.eup %607 }
 0x95c   :  { %v463_v16 = vmul.f32 0.6931472, %v608_v15 }
 0x95e   :  { %v464_v17 = vsub.f32 %v452_v3, %v463_v16 }
 0x960   :  { %v466_v18 = vsel %vm465_vm10, %v464_v17, 0.0 }
 0x961   :  { %v467_v19 = vrot.slane %v466_v18, 4 }
 0x963   :  { %v468_v20 = vadd.f32 %v467_v19, %v466_v18 }
 0x965   :  { %v469_v21 = vrot.slane %v468_v20, 2 }
 0x967   :  { %v470_v23 = vadd.f32 %v469_v21, %v468_v20 }
 0x969   :  { %v471_v24 = vrot.slane %v470_v23, 1 }
 0x96b   :  { %v472_v25 = vadd.f32 %v471_v24, %v470_v23 }
 0x96d   :  { %v473_v27 = vsub.f32 0.0, %v472_v25 }
 0x96f   :  { %v474_v28 = vmul.f32 0.5, %v473_v27 }
 0x971   :  { %476 = vst.msk [vmem:[#allocation2] sm:$0x1] %vm475_vm11, %v474_v28 }
 0x972   :  { %487 = dma.vmem_to_hbm [thread:$0]  %s483_s6, 16, %s485_s9, [#allocation3]  }
 0x973   :  { %633 = dma.done.wait [#allocation3], 16  }
 0x974   :  { %634 = vsyncadd [#allocation3], 4294967280 }
 0x975   :  { %492 = vsyncpa [#allocation3], 1 }

</bundles_post_ra>
